<compile_context>
chip_gen: v5e
topology: v5e:2x2
jax: 0.10.0
libtpu: 0.0.40
codegen_flags: <defaults>
</compile_context>

<pallas_src>
import jax
import jax.numpy as jnp
from jax.experimental import pallas as pl
from jax.experimental.pallas import tpu as pltpu


def _round_up(n: int, m: int) -> int:
    return (n + m - 1) // m * m


def _autoencoder_kernel(x_ref,
                        w1_ref, b1_ref,
                        w2_ref, b2_ref,
                        w3_ref, b3_ref,
                        w4_ref, b4_ref,
                        enc_ref, dec_ref):
    """One batch tile: 4 matmuls (bf16 MXU, f32 acc) + ReLU / tanh-sigmoid."""
    x = x_ref[...].astype(jnp.bfloat16)  # (TB, D_in)

    # Encoder
    h1 = jnp.maximum(
        jnp.dot(x, w1_ref[...], preferred_element_type=jnp.float32)
        + b1_ref[...], 0.0)
    enc = jnp.maximum(
        jnp.dot(h1.astype(jnp.bfloat16), w2_ref[...],
                preferred_element_type=jnp.float32) + b2_ref[...], 0.0)

    # Decoder
    h3 = jnp.maximum(
        jnp.dot(enc.astype(jnp.bfloat16), w3_ref[...],
                preferred_element_type=jnp.float32) + b3_ref[...], 0.0)
    z = jnp.dot(h3.astype(jnp.bfloat16), w4_ref[...],
                preferred_element_type=jnp.float32) + b4_ref[...]
    # sigmoid(z) == 0.5 * (tanh(0.5*z) + 1): one EUP transcendental, near-exact.
    dec = 0.5 * (jnp.tanh(0.5 * z) + 1.0)

    enc_ref[...] = enc.astype(enc_ref.dtype)
    dec_ref[...] = dec.astype(dec_ref.dtype)


def arbitrage_autoencoder_forward(x, params, *, block_batch=2048):
    """Full autoencoder forward in one Pallas call, tiled over the batch.

    x:       (B, D_in)  (f32 or bf16; passing bf16 halves input DMA)
    params:  dict with w1..w4 stored as (in, out) bfloat16 (PyTorch weight.T)
             and b1..b4 stored as (1, out) float32, so each layer is
             y = x @ w + b.
    Returns (encoded (B, L) f32, decoded (B, D_in) f32).
    """
    B, D_in = x.shape
    E = params["w1"].shape[1]
    L = params["w2"].shape[1]

    # --- batch tile: big (amortize per-step overhead), multiple of 8, and
    # capped so there are >= 2 grid steps when possible (v7x has 2 TCs).
    TB = min(block_batch, _round_up(B, 8))
    if B > 8:
        TB = min(TB, _round_up(pl.cdiv(B, 2), 8))
    TB = max(TB, 8)
    grid = (pl.cdiv(B, TB),)

    # --- VMEM / cost bookkeeping.
    weight_keys = ("w1", "b1", "w2", "b2", "w3", "b3", "w4", "b4")
    weight_bytes = sum(int(params[k].size) * params[k].dtype.itemsize
                       for k in weight_keys)
    x_tile_bytes = TB * D_in * x.dtype.itemsize
    out_tile_bytes = TB * (D_in + L) * 4
    interm_bytes = TB * (2 * E + L + D_in) * 4
    vmem_est = 2 * (x_tile_bytes + out_tile_bytes) + 2 * weight_bytes + interm_bytes

    cparams = dict(dimension_semantics=("parallel",))
    if vmem_est > 12 * 1024 * 1024:
        # Leave headroom under v5e's 16 MiB default scoped-VMEM limit.
        cparams["vmem_limit_bytes"] = min(int(vmem_est * 2), 100 * 1024 * 1024)

    cost = pl.CostEstimate(
        flops=2 * B * (D_in * E + E * L + L * E + E * D_in),
        transcendentals=B * D_in,                      # one tanh per decoded elem
        bytes_accessed=(B * D_in * x.dtype.itemsize    # x in
                        + weight_bytes                 # resident weights (once)
                        + B * (D_in + L) * 4))         # decoded + encoded out

    # Batch-tiled arrays march with the grid; weights/biases stay resident.
    batch_spec = lambda width: pl.BlockSpec((TB, width), lambda i: (i, 0))
    resident = lambda shape: pl.BlockSpec(shape, lambda i: (0, 0))

    encoded, decoded = pl.pallas_call(
        _autoencoder_kernel,
        out_shape=(jax.ShapeDtypeStruct((B, L), jnp.float32),
                   jax.ShapeDtypeStruct((B, D_in), jnp.float32)),
        grid=grid,
        in_specs=[
            batch_spec(D_in),                           # x
            resident((D_in, E)), resident((1, E)),      # layer 1
            resident((E, L)),    resident((1, L)),      # layer 2
            resident((L, E)),    resident((1, E)),      # layer 3
            resident((E, D_in)), resident((1, D_in)),   # layer 4
        ],
        out_specs=(batch_spec(L), batch_spec(D_in)),
        compiler_params=pltpu.CompilerParams(**cparams),
        cost_estimate=cost,
    )(x,
      params["w1"], params["b1"],
      params["w2"], params["b2"],
      params["w3"], params["b3"],
      params["w4"], params["b4"])

    return encoded, decoded


def init_params(key, d_in, encoding_dim, latent_dim):
    """Deterministic synthetic init (uniform, PyTorch-Linear-like scaling).

    Weights stored bf16 (kernel matmul dtype), biases stored f32.
    """
    ks = jax.random.split(key, 8)

    def lin(kw, kb, fan_in, fan_out):
        bound = 1.0 / jnp.sqrt(fan_in)
        w = jax.random.uniform(kw, (fan_in, fan_out), jnp.float32, -bound, bound)
        b = jax.random.uniform(kb, (1, fan_out), jnp.float32, -bound, bound)
        return w.astype(jnp.bfloat16), b

    w1, b1 = lin(ks[0], ks[1], d_in, encoding_dim)
    w2, b2 = lin(ks[2], ks[3], encoding_dim, latent_dim)
    w3, b3 = lin(ks[4], ks[5], latent_dim, encoding_dim)
    w4, b4 = lin(ks[6], ks[7], encoding_dim, d_in)
    return dict(w1=w1, b1=b1, w2=w2, b2=b2, w3=w3, b3=b3, w4=w4, b4=b4)


def _reference_forward(x, p):
    """Pure-JAX reference using the same (bf16-stored) parameters, f32 math."""
    f32 = lambda a: a.astype(jnp.float32)
    h1 = jnp.maximum(f32(x) @ f32(p["w1"]) + p["b1"], 0.0)
    enc = jnp.maximum(h1 @ f32(p["w2"]) + p["b2"], 0.0)
    h3 = jnp.maximum(enc @ f32(p["w3"]) + p["b3"], 0.0)
    dec = jax.nn.sigmoid(h3 @ f32(p["w4"]) + p["b4"])
    return enc, dec


if __name__ == "__main__":
    # Shapes consistent with the module: input_dim=4, sequence_length=16
    # -> flattened D_in = 64; encoding_dim=128, latent_dim=32.
    # Batch 256 with block_batch=2048 -> TB is capped to 128 so grid=(2,),
    # exercising the batch pipeline / dual-TC split while staying small.
    input_dim, sequence_length = 4, 16
    encoding_dim, latent_dim = 128, 32
    batch = 256
    d_in = input_dim * sequence_length

    key = jax.random.PRNGKey(0)
    kx, kp = jax.random.split(key)
    x = jax.random.normal(kx, (batch, d_in), dtype=jnp.float32)
    params = init_params(kp, d_in, encoding_dim, latent_dim)

    encoded, decoded = arbitrage_autoencoder_forward(x, params)
    encoded = jax.block_until_ready(encoded)
    decoded = jax.block_until_ready(decoded)

    # Sanity check against a pure-JAX reference (tolerance covers bf16
    # activation casts feeding the MXU; no approximate reciprocal anymore).
    enc_ref, dec_ref = _reference_forward(x, params)
    assert encoded.shape == (batch, latent_dim)
    assert decoded.shape == (batch, d_in)
    assert jnp.allclose(encoded, enc_ref, atol=2.5e-2, rtol=2.5e-2)
    assert jnp.allclose(decoded, dec_ref, atol=1.5e-2, rtol=1.5e-2)

    print("KERNEL_OK")
</pallas_src>

<mosaic_0001>
module attributes {stable_mosaic.version = 11 : i64} {
  func.func @_autoencoder_kernel(%arg0: i32, %arg1: memref<128x64xf32, #tpu.memory_space<vmem>>, %arg2: memref<64x128xbf16, #tpu.memory_space<vmem>>, %arg3: memref<1x128xf32, #tpu.memory_space<vmem>>, %arg4: memref<128x32xbf16, #tpu.memory_space<vmem>>, %arg5: memref<1x32xf32, #tpu.memory_space<vmem>>, %arg6: memref<32x128xbf16, #tpu.memory_space<vmem>>, %arg7: memref<1x128xf32, #tpu.memory_space<vmem>>, %arg8: memref<128x64xbf16, #tpu.memory_space<vmem>>, %arg9: memref<1x64xf32, #tpu.memory_space<vmem>>, %arg10: memref<128x32xf32, #tpu.memory_space<vmem>>, %arg11: memref<128x64xf32, #tpu.memory_space<vmem>>) attributes {dimension_semantics = [#tpu.dimension_semantics<parallel>], iteration_bounds = array<i64: 2>, scalar_prefetch = 0 : i64, scratch_operands = 0 : i64, tpu.core_type = #tpu.core_type<tc>, window_params = [{transform_indices = @transform_0, window_bounds = array<i64: 128, 64>}, {pipeline_mode = #tpu.pipeline_mode<synchronous>, transform_indices = @transform_1, window_bounds = array<i64: 64, 128>}, {pipeline_mode = #tpu.pipeline_mode<synchronous>, transform_indices = @transform_2, window_bounds = array<i64: 1, 128>}, {pipeline_mode = #tpu.pipeline_mode<synchronous>, transform_indices = @transform_3, window_bounds = array<i64: 128, 32>}, {pipeline_mode = #tpu.pipeline_mode<synchronous>, transform_indices = @transform_4, window_bounds = array<i64: 1, 32>}, {pipeline_mode = #tpu.pipeline_mode<synchronous>, transform_indices = @transform_5, window_bounds = array<i64: 32, 128>}, {pipeline_mode = #tpu.pipeline_mode<synchronous>, transform_indices = @transform_6, window_bounds = array<i64: 1, 128>}, {pipeline_mode = #tpu.pipeline_mode<synchronous>, transform_indices = @transform_7, window_bounds = array<i64: 128, 64>}, {pipeline_mode = #tpu.pipeline_mode<synchronous>, transform_indices = @transform_8, window_bounds = array<i64: 1, 64>}, {transform_indices = @transform_9, window_bounds = array<i64: 128, 32>}, {transform_indices = @transform_10, window_bounds = array<i64: 128, 64>}]} {
    %c0 = arith.constant 0 : index
    %c0_0 = arith.constant 0 : index
    %0 = vector.load %arg1[%c0, %c0_0] : memref<128x64xf32, #tpu.memory_space<vmem>>, vector<128x64xf32>
    %1 = arith.truncf %0 : vector<128x64xf32> to vector<128x64xbf16>
    %c0_1 = arith.constant 0 : index
    %c0_2 = arith.constant 0 : index
    %2 = vector.load %arg2[%c0_1, %c0_2] : memref<64x128xbf16, #tpu.memory_space<vmem>>, vector<64x128xbf16>
    %cst = arith.constant dense<0.000000e+00> : vector<128x128xf32>
    %3 = tpu.matmul %1, %2, %cst {dimension_numbers = #tpu.dot_dimension_numbers<[1], [0], [0], [1], [0, 0, 1, 1], [], []>} : vector<128x64xbf16>, vector<64x128xbf16>, vector<128x128xf32> -> vector<128x128xf32>
    %c0_3 = arith.constant 0 : index
    %c0_4 = arith.constant 0 : index
    %4 = vector.load %arg3[%c0_3, %c0_4] : memref<1x128xf32, #tpu.memory_space<vmem>>, vector<1x128xf32>
    %5 = vector.broadcast %4 : vector<1x128xf32> to vector<128x128xf32>
    %6 = arith.addf %3, %5 : vector<128x128xf32>
    %cst_5 = arith.constant 0.000000e+00 : f32
    %7 = vector.broadcast %cst_5 : f32 to vector<128x128xf32>
    %8 = arith.maximumf %6, %7 : vector<128x128xf32>
    %9 = arith.truncf %8 : vector<128x128xf32> to vector<128x128xbf16>
    %c0_6 = arith.constant 0 : index
    %c0_7 = arith.constant 0 : index
    %10 = vector.load %arg4[%c0_6, %c0_7] : memref<128x32xbf16, #tpu.memory_space<vmem>>, vector<128x32xbf16>
    %cst_8 = arith.constant dense<0.000000e+00> : vector<128x32xf32>
    %11 = tpu.matmul %9, %10, %cst_8 {dimension_numbers = #tpu.dot_dimension_numbers<[1], [0], [0], [1], [0, 0, 1, 1], [], []>} : vector<128x128xbf16>, vector<128x32xbf16>, vector<128x32xf32> -> vector<128x32xf32>
    %c0_9 = arith.constant 0 : index
    %c0_10 = arith.constant 0 : index
    %12 = vector.load %arg5[%c0_9, %c0_10] : memref<1x32xf32, #tpu.memory_space<vmem>>, vector<1x32xf32>
    %13 = vector.broadcast %12 : vector<1x32xf32> to vector<128x32xf32>
    %14 = arith.addf %11, %13 : vector<128x32xf32>
    %cst_11 = arith.constant 0.000000e+00 : f32
    %15 = vector.broadcast %cst_11 : f32 to vector<128x32xf32>
    %16 = arith.maximumf %14, %15 : vector<128x32xf32>
    %17 = arith.truncf %16 : vector<128x32xf32> to vector<128x32xbf16>
    %c0_12 = arith.constant 0 : index
    %c0_13 = arith.constant 0 : index
    %18 = vector.load %arg6[%c0_12, %c0_13] : memref<32x128xbf16, #tpu.memory_space<vmem>>, vector<32x128xbf16>
    %cst_14 = arith.constant dense<0.000000e+00> : vector<128x128xf32>
    %19 = tpu.matmul %17, %18, %cst_14 {dimension_numbers = #tpu.dot_dimension_numbers<[1], [0], [0], [1], [0, 0, 1, 1], [], []>} : vector<128x32xbf16>, vector<32x128xbf16>, vector<128x128xf32> -> vector<128x128xf32>
    %c0_15 = arith.constant 0 : index
    %c0_16 = arith.constant 0 : index
    %20 = vector.load %arg7[%c0_15, %c0_16] : memref<1x128xf32, #tpu.memory_space<vmem>>, vector<1x128xf32>
    %21 = vector.broadcast %20 : vector<1x128xf32> to vector<128x128xf32>
    %22 = arith.addf %19, %21 : vector<128x128xf32>
    %cst_17 = arith.constant 0.000000e+00 : f32
    %23 = vector.broadcast %cst_17 : f32 to vector<128x128xf32>
    %24 = arith.maximumf %22, %23 : vector<128x128xf32>
    %25 = arith.truncf %24 : vector<128x128xf32> to vector<128x128xbf16>
    %c0_18 = arith.constant 0 : index
    %c0_19 = arith.constant 0 : index
    %26 = vector.load %arg8[%c0_18, %c0_19] : memref<128x64xbf16, #tpu.memory_space<vmem>>, vector<128x64xbf16>
    %cst_20 = arith.constant dense<0.000000e+00> : vector<128x64xf32>
    %27 = tpu.matmul %25, %26, %cst_20 {dimension_numbers = #tpu.dot_dimension_numbers<[1], [0], [0], [1], [0, 0, 1, 1], [], []>} : vector<128x128xbf16>, vector<128x64xbf16>, vector<128x64xf32> -> vector<128x64xf32>
    %c0_21 = arith.constant 0 : index
    %c0_22 = arith.constant 0 : index
    %28 = vector.load %arg9[%c0_21, %c0_22] : memref<1x64xf32, #tpu.memory_space<vmem>>, vector<1x64xf32>
    %29 = vector.broadcast %28 : vector<1x64xf32> to vector<128x64xf32>
    %30 = arith.addf %27, %29 : vector<128x64xf32>
    %cst_23 = arith.constant 5.000000e-01 : f32
    %31 = vector.broadcast %cst_23 : f32 to vector<128x64xf32>
    %32 = arith.mulf %31, %30 : vector<128x64xf32>
    %33 = math.tanh %32 : vector<128x64xf32>
    %cst_24 = arith.constant 1.000000e+00 : f32
    %34 = vector.broadcast %cst_24 : f32 to vector<128x64xf32>
    %35 = arith.addf %33, %34 : vector<128x64xf32>
    %cst_25 = arith.constant 5.000000e-01 : f32
    %36 = vector.broadcast %cst_25 : f32 to vector<128x64xf32>
    %37 = arith.mulf %36, %35 : vector<128x64xf32>
    %c0_26 = arith.constant 0 : index
    %c0_27 = arith.constant 0 : index
    %38 = vector.load %arg10[%c0_26, %c0_27] : memref<128x32xf32, #tpu.memory_space<vmem>>, vector<128x32xf32>
    tpu.vector_store %arg10[%c0_26, %c0_27], %16 {strides = array<i32>} : memref<128x32xf32, #tpu.memory_space<vmem>>, vector<128x32xf32>,
    %c0_28 = arith.constant 0 : index
    %c0_29 = arith.constant 0 : index
    %39 = vector.load %arg11[%c0_28, %c0_29] : memref<128x64xf32, #tpu.memory_space<vmem>>, vector<128x64xf32>
    tpu.vector_store %arg11[%c0_28, %c0_29], %37 {strides = array<i32>} : memref<128x64xf32, #tpu.memory_space<vmem>>, vector<128x64xf32>,
    return
  }
  func.func @transform_0(%arg0: i32) -> (i32, i32) {
    %c0_i32 = arith.constant 0 : i32
    %c0_i32_0 = arith.constant 0 : i32
    return %arg0, %c0_i32 : i32, i32
  }
  func.func @transform_1(%arg0: i32) -> (i32, i32) {
    %c0_i32 = arith.constant 0 : i32
    %c0_i32_0 = arith.constant 0 : i32
    %c0_i32_1 = arith.constant 0 : i32
    return %c0_i32, %c0_i32_0 : i32, i32
  }
  func.func @transform_2(%arg0: i32) -> (i32, i32) {
    %c0_i32 = arith.constant 0 : i32
    %c0_i32_0 = arith.constant 0 : i32
    %c0_i32_1 = arith.constant 0 : i32
    return %c0_i32, %c0_i32_0 : i32, i32
  }
  func.func @transform_3(%arg0: i32) -> (i32, i32) {
    %c0_i32 = arith.constant 0 : i32
    %c0_i32_0 = arith.constant 0 : i32
    %c0_i32_1 = arith.constant 0 : i32
    return %c0_i32, %c0_i32_0 : i32, i32
  }
  func.func @transform_4(%arg0: i32) -> (i32, i32) {
    %c0_i32 = arith.constant 0 : i32
    %c0_i32_0 = arith.constant 0 : i32
    %c0_i32_1 = arith.constant 0 : i32
    return %c0_i32, %c0_i32_0 : i32, i32
  }
  func.func @transform_5(%arg0: i32) -> (i32, i32) {
    %c0_i32 = arith.constant 0 : i32
    %c0_i32_0 = arith.constant 0 : i32
    %c0_i32_1 = arith.constant 0 : i32
    return %c0_i32, %c0_i32_0 : i32, i32
  }
  func.func @transform_6(%arg0: i32) -> (i32, i32) {
    %c0_i32 = arith.constant 0 : i32
    %c0_i32_0 = arith.constant 0 : i32
    %c0_i32_1 = arith.constant 0 : i32
    return %c0_i32, %c0_i32_0 : i32, i32
  }
  func.func @transform_7(%arg0: i32) -> (i32, i32) {
    %c0_i32 = arith.constant 0 : i32
    %c0_i32_0 = arith.constant 0 : i32
    %c0_i32_1 = arith.constant 0 : i32
    return %c0_i32, %c0_i32_0 : i32, i32
  }
  func.func @transform_8(%arg0: i32) -> (i32, i32) {
    %c0_i32 = arith.constant 0 : i32
    %c0_i32_0 = arith.constant 0 : i32
    %c0_i32_1 = arith.constant 0 : i32
    return %c0_i32, %c0_i32_0 : i32, i32
  }
  func.func @transform_9(%arg0: i32) -> (i32, i32) {
    %c0_i32 = arith.constant 0 : i32
    %c0_i32_0 = arith.constant 0 : i32
    return %arg0, %c0_i32 : i32, i32
  }
  func.func @transform_10(%arg0: i32) -> (i32, i32) {
    %c0_i32 = arith.constant 0 : i32
    %c0_i32_0 = arith.constant 0 : i32
    return %arg0, %c0_i32 : i32, i32
  }
}

</mosaic_0001>

<bundles_post_ra>
// kernel: tpu_custom_call.1
= control target key start
LH: loop header
LB: loop body
LE: loop exit
PB: predicated region body
PF: predicated region fallthrough
CT: control target
= control target key end

     0   :  { %s1344_s13 = smov 0   ;;  %s1603_s0 = inlined_call_operand.vmem [shape: f32[256,64], index: 0, kind: input, shape index: {}]   ;;  %s1604_s1 = inlined_call_operand.vmem [shape: bf16[64,128], index: 1, kind: input, shape index: {}]   ;;  %s1605_s2 = inlined_call_operand.vmem [shape: f32[1,128], index: 2, kind: input, shape index: {}]   ;;  %s1606_s3 = inlined_call_operand.vmem [shape: bf16[128,32], index: 3, kind: input, shape index: {}]   ;;  %s1607_s4 = inlined_call_operand.vmem [shape: f32[1,32], index: 4, kind: input, shape index: {}]   ;;  %s1608_s5 = inlined_call_operand.vmem [shape: bf16[32,128], index: 5, kind: input, shape index: {}]   ;;  %s1609_s6 = inlined_call_operand.vmem [shape: f32[1,128], index: 6, kind: input, shape index: {}]   ;;  %s1610_s7 = inlined_call_operand.vmem [shape: bf16[128,64], index: 7, kind: input, shape index: {}]   ;;  %s1611_s8 = inlined_call_operand.vmem [shape: f32[1,64], index: 8, kind: input, shape index: {}]   ;;  %s1612_s9 = inlined_call_operand.vmem [shape: f32[256,32], index: 9, kind: output, shape index: {0}]   ;;  %s1613_s10 = inlined_call_operand.vmem [shape: f32[256,64], index: 10, kind: output, shape index: {1}]  }
   0x1 LB: > { %s1098_s14 = sadd.s32 4294967295, %s1287_s13   ;;  %p1102_p0 = scmp.ge.s32.totalorder %s1287_s13, 1  ;;  %s1287_s13 = sphi %s1344_s13, %s21_s13  }
   0x2   : > { %p316_p1 = scmp.lt.s32.totalorder %s1287_s13, 3 }
   0x4   : > { %p317_p2 = pnand %p1102_p0, %p316_p1 }
   0x5   : > { %s1103_s17 = sshll.u32 (!%p317_p2), %s1098_s14, 4 }
   0x6   : > { %320 = sbr.rel (%p317_p2) target bundleno = 721 (0x2d1), region = 56  ;;  %p360_p3 = scmp.lt.s32.totalorder (!%p317_p2), %s1103_s17, 31 }
   0xb   : > { %v1218_v0 = vld [vmem:[%s1604_s1 + $0x18] sm:$0xff]  ;;  %v1217_v1 = vld [vmem:[%s1604_s1 + $0x10] sm:$0xff]  ;;  %s1615_s17 = smov (!%p360_p3, %s1103_s17), 31  ;;  %v1216_v2 = vld [vmem:[%s1604_s1 + $0x8] sm:$0xff]  ;;  %vm438_vm0 = vcmask 523264   ;;  %vm697_vm1 = vcmask 261120  }
   0xc   : > { %467 = vmatpush.bf16.msra.mxu0 %v1218_v0  ;;  %s1358_s20 = sshll.u32 %s1615_s17, 3  ;;  %v1215_v3 = vld [vmem:[%s1604_s1] sm:$0xff]  ;;  %v1226_v19 = vld [vmem:[%s1606_s3 + $0x38] sm:$0xff]  ;;  %v1225_v23 = vld [vmem:[%s1606_s3 + $0x30] sm:$0xff] }
   0xd   : > { %s1367_s25 = scalar_lea.vmem %s1603_s0, %s1358_s20  ;;  %604 = vmatpush.bf16.msra.mxu1 %v1226_v19  ;;  %v1224_v24 = vld [vmem:[%s1606_s3 + $0x28] sm:$0xff]  ;;  %v1223_v25 = vld [vmem:[%s1606_s3 + $0x20] sm:$0xff]  ;;  %v1222_v28 = vld [vmem:[%s1606_s3 + $0x18] sm:$0xff]  ;;  %s1457_s17 = scalar_lea.vmem %s1612_s9, %s1358_s20 }
   0xe   : > { %v378_v4 = vld [vmem:[%s1367_s25] sm:$0xff]  ;;  %v379_v5 = vld [vmem:[%s1367_s25 + $0x8] sm:$0xff]  ;;  %v380_v7 = vld [vmem:[%s1367_s25 + $0x10] sm:$0xff]  ;;  %s1552_s23 = scalar_lea.vmem %s1613_s10, %s1358_s20 }
   0xf   : > { %v394_v6 = vpack.c.bf16 %v379_v5, %v378_v4  ;;  %v381_v8 = vld [vmem:[%s1367_s25 + $0x18] sm:$0xff]  ;;  %v382_v10 = vld [vmem:[%s1367_s25 + $0x20] sm:$0xff]  ;;  %v383_v11 = vld [vmem:[%s1367_s25 + $0x28] sm:$0xff] }
  0x10   : > { %468 = vmatpush.bf16.msra.mxu0 %v1217_v1  ;;  %v395_v9 = vpack.c.bf16 %v381_v8, %v380_v7  ;;  %v396_v12 = vpack.c.bf16 %v383_v11, %v382_v10  ;;  %v384_v13 = vld [vmem:[%s1367_s25 + $0x30] sm:$0xff]  ;;  %v385_v14 = vld [vmem:[%s1367_s25 + $0x38] sm:$0xff]  ;;  %v386_v16 = vld [vmem:[%s1367_s25 + $0x40] sm:$0xff] }
  0x11   : > { %v397_v15 = vpack.c.bf16 %v385_v14, %v384_v13  ;;  %v387_v17 = vld [vmem:[%s1367_s25 + $0x48] sm:$0xff]  ;;  %v388_v20 = vld [vmem:[%s1367_s25 + $0x50] sm:$0xff]  ;;  %v389_v21 = vld [vmem:[%s1367_s25 + $0x58] sm:$0xff]  ;;  %605 = vmatpush.bf16.msra.mxu1 %v1225_v23 }
  0x12   : > { %v398_v18 = vpack.c.bf16 %v387_v17, %v386_v16  ;;  %v399_v22 = vpack.c.bf16 %v389_v21, %v388_v20  ;;  %v390_v26 = vld [vmem:[%s1367_s25 + $0x60] sm:$0xff]  ;;  %v391_v27 = vld [vmem:[%s1367_s25 + $0x68] sm:$0xff]  ;;  %v1221_v30 = vld [vmem:[%s1606_s3 + $0x10] sm:$0xff] }
  0x13   : > { %v400_v29 = vpack.c.bf16 %v391_v27, %v390_v26  ;;  %v1220_v31 = vld [vmem:[%s1606_s3 + $0x8] sm:$0xff]  ;;  %v1219_v32 = vld [vmem:[%s1606_s3] sm:$0xff]  ;;  %v392_v33 = vld [vmem:[%s1367_s25 + $0x70] sm:$0xff] }
  0x14   : > { %469 = vmatpush.bf16.msra.mxu0 %v1216_v2  ;;  %v393_v34 = vld [vmem:[%s1367_s25 + $0x78] sm:$0xff]  ;;  %v1423_v37 = vld [vmem:[%s1605_s2] ss:$0 sm:$0xff]  ;;  %v1228_v23 = vld [vmem:[%s1608_s5 + $0x8] sm:$0xff] }
  0x15   : > { %606 = vmatpush.bf16.msra.mxu1 %v1224_v24  ;;  %v401_v35 = vpack.c.bf16 %v393_v34, %v392_v33  ;;  %728 = vmatpush.bf16.msra.mxu2 %v1228_v23  ;;  %v1227_v24 = vld [vmem:[%s1608_s5] sm:$0xff] }
  0x18   : > { %470 = vmatpush.bf16.msra.mxu0 %v1215_v3 }
  0x19   : > { %607 = vmatpush.bf16.msra.mxu1 %v1223_v25  ;;  %729 = vmatpush.bf16.msra.mxu2 %v1227_v24 }
  0x1b   : > { %1125 = vmatmul.msk.bf16.vlgmr.msra.gmra.mxu0 %vm438_vm0, %v394_v6 }
  0x1d   : > { %608 = vmatpush.bf16.msra.mxu1 %v1222_v28 }
  0x21   : > { %609 = vmatpush.bf16.msra.mxu1 %v1221_v30 }
  0x25   : > { %610 = vmatpush.bf16.msra.mxu1 %v1220_v31  ;;  %v1450_v31 = vld [vmem:[%s1607_s4] ss:$0 sm:$0xff] }
  0x29   : > { %611 = vmatpush.bf16.msra.mxu1 %v1219_v32 }
  0x2b   : > { %1126 = vmatmul.msk.bf16.gmra.mxu0 %vm438_vm0, %v395_v9 }
  0x3b   : > { %1127 = vmatmul.msk.bf16.gmra.mxu0 %vm438_vm0, %v396_v12 }
  0x4b   : > { %1128 = vmatmul.msk.bf16.gmra.mxu0 %vm438_vm0, %v397_v15 }
  0x5b   : > { %1129 = vmatmul.msk.bf16.gmra.mxu0 %vm438_vm0, %v398_v18 }
  0x6b   : > { %1130 = vmatmul.msk.bf16.gmra.mxu0 %vm438_vm0, %v399_v22 }
  0x7b   : > { %1131 = vmatmul.msk.bf16.gmra.mxu0 %vm438_vm0, %v400_v29 }
  0x8b   : > { %1132 = vmatmul.msk.bf16.gmra.mxu0 %vm438_vm0, %v401_v35 }
  0x98   : > { %v472_v36 = vpop.f32.mrf.mxu0 }
  0x99   : > { %v473_v38 = vadd.f32 %v1423_v37, %v472_v36 }
  0x9b   : > { %v512_v41 = vmax.f32 %v473_v38, 0.0 }
  0xa0   : > { %v474_v39 = vpop.f32.mrf.mxu0 }
  0xa1   : > { %v475_v40 = vadd.f32 %v1423_v37, %v474_v39 }
  0xa3   : > { %v513_v42 = vmax.f32 %v475_v40, 0.0 }
  0xa5   : > { %v528_v43 = vpack.c.bf16 %v513_v42, %v512_v41 }
  0xa7   : > { %612 = vmatmul.bf16.vlgmr.msra.gmra.mxu1 %v528_v43 }
  0xa8   : > { %v477_v44 = vpop.f32.mrf.mxu0 }
  0xa9   : > { %v478_v45 = vadd.f32 %v1423_v37, %v477_v44 }
  0xab   : > { %v514_v48 = vmax.f32 %v478_v45, 0.0 }
  0xb0   : > { %v479_v46 = vpop.f32.mrf.mxu0 }
  0xb1   : > { %v480_v47 = vadd.f32 %v1423_v37, %v479_v46 }
  0xb3   : > { %v515_v49 = vmax.f32 %v480_v47, 0.0 }
  0xb5   : > { %v529_v50 = vpack.c.bf16 %v515_v49, %v514_v48 }
  0xb7   : > { %617 = vmatmul.bf16.gmra.mxu1 %v529_v50 }
  0xb8   : > { %v482_v51 = vpop.f32.mrf.mxu0 }
  0xb9   : > { %v483_v52 = vadd.f32 %v1423_v37, %v482_v51 }
  0xbb   : > { %v516_v55 = vmax.f32 %v483_v52, 0.0 }
  0xc0   : > { %v484_v53 = vpop.f32.mrf.mxu0 }
  0xc1   : > { %v485_v54 = vadd.f32 %v1423_v37, %v484_v53 }
  0xc3   : > { %v517_v56 = vmax.f32 %v485_v54, 0.0 }
  0xc5   : > { %v530_v57 = vpack.c.bf16 %v517_v56, %v516_v55 }
  0xc7   : > { %622 = vmatmul.bf16.gmra.mxu1 %v530_v57 }
  0xc8   : > { %v487_v58 = vpop.f32.mrf.mxu0 }
  0xc9   : > { %v488_v59 = vadd.f32 %v1423_v37, %v487_v58 }
  0xcb   : > { %v518_v62 = vmax.f32 %v488_v59, 0.0 }
  0xd0   : > { %v489_v60 = vpop.f32.mrf.mxu0 }
  0xd1   : > { %v490_v61 = vadd.f32 %v1423_v37, %v489_v60 }
  0xd3   : > { %v519_v63 = vmax.f32 %v490_v61, 0.0 }
  0xd5   : > { %v531_v0 = vpack.c.bf16 %v519_v63, %v518_v62 }
  0xd7   : > { %627 = vmatmul.bf16.gmra.mxu1 %v531_v0 }
  0xd8   : > { %v492_v1 = vpop.f32.mrf.mxu0 }
  0xd9   : > { %v493_v2 = vadd.f32 %v1423_v37, %v492_v1 }
  0xdb   : > { %v520_v5 = vmax.f32 %v493_v2, 0.0 }
  0xe0   : > { %v494_v3 = vpop.f32.mrf.mxu0 }
  0xe1   : > { %v495_v4 = vadd.f32 %v1423_v37, %v494_v3 }
  0xe3   : > { %v521_v6 = vmax.f32 %v495_v4, 0.0 }
  0xe5   : > { %v532_v7 = vpack.c.bf16 %v521_v6, %v520_v5 }
  0xe7   : > { %632 = vmatmul.bf16.gmra.mxu1 %v532_v7 }
  0xe8   : > { %v497_v8 = vpop.f32.mrf.mxu0 }
  0xe9   : > { %v498_v9 = vadd.f32 %v1423_v37, %v497_v8 }
  0xeb   : > { %v522_v12 = vmax.f32 %v498_v9, 0.0 }
  0xf0   : > { %v499_v10 = vpop.f32.mrf.mxu0 }
  0xf1   : > { %v500_v11 = vadd.f32 %v1423_v37, %v499_v10  ;;  %v1236_v10 = vld [vmem:[%s1610_s7 + $0x38] sm:$0xff] }
  0xf2   : > { %863 = vmatpush.bf16.msra.mxu3 %v1236_v10 }
  0xf3   : > { %v523_v13 = vmax.f32 %v500_v11, 0.0 }
  0xf5   : > { %v533_v14 = vpack.c.bf16 %v523_v13, %v522_v12  ;;  %v1235_v13 = vld [vmem:[%s1610_s7 + $0x30] sm:$0xff] }
  0xf6   : > { %864 = vmatpush.bf16.msra.mxu3 %v1235_v13 }
  0xf7   : > { %637 = vmatmul.bf16.gmra.mxu1 %v533_v14 }
  0xf8   : > { %v502_v15 = vpop.f32.mrf.mxu0 }
  0xf9   : > { %v503_v16 = vadd.f32 %v1423_v37, %v502_v15  ;;  %v1234_v15 = vld [vmem:[%s1610_s7 + $0x28] sm:$0xff] }
  0xfa   : > { %865 = vmatpush.bf16.msra.mxu3 %v1234_v15 }
  0xfb   : > { %v524_v19 = vmax.f32 %v503_v16, 0.0 }
 0x100   : > { %v504_v17 = vpop.f32.mrf.mxu0 }
 0x101   : > { %v505_v18 = vadd.f32 %v1423_v37, %v504_v17 }
 0x103   : > { %v525_v20 = vmax.f32 %v505_v18, 0.0  ;;  %v1233_v18 = vld [vmem:[%s1610_s7 + $0x20] sm:$0xff] }
 0x104   : > { %866 = vmatpush.bf16.msra.mxu3 %v1233_v18 }
 0x105   : > { %v534_v21 = vpack.c.bf16 %v525_v20, %v524_v19 }
 0x107   : > { %642 = vmatmul.bf16.gmra.mxu1 %v534_v21 }
 0x108   : > { %v507_v22 = vpop.f32.mrf.mxu0 }
 0x109   : > { %v508_v25 = vadd.f32 %v1423_v37, %v507_v22  ;;  %v1232_v22 = vld [vmem:[%s1610_s7 + $0x18] sm:$0xff] }
 0x10a   : > { %867 = vmatpush.bf16.msra.mxu3 %v1232_v22 }
 0x10b   : > { %v526_v28 = vmax.f32 %v508_v25, 0.0  ;;  %v1231_v25 = vld [vmem:[%s1610_s7 + $0x10] sm:$0xff] }
 0x10e   : > { %868 = vmatpush.bf16.msra.mxu3 %v1231_v25  ;;  %v1544_v25 = vld [vmem:[%s1611_s8] ss:$0 sm:$0xff] }
 0x110   : > { %v509_v26 = vpop.f32.mrf.mxu0 }
 0x111   : > { %v510_v27 = vadd.f32 %v1423_v37, %v509_v26 }
 0x113   : > { %v527_v29 = vmax.f32 %v510_v27, 0.0  ;;  %v1230_v27 = vld [vmem:[%s1610_s7 + $0x8] sm:$0xff] }
 0x114   : > { %869 = vmatpush.bf16.msra.mxu3 %v1230_v27 }
 0x115   : > { %v535_v30 = vpack.c.bf16 %v527_v29, %v526_v28 }
 0x117   : > { %647 = vmatmul.bf16.gmra.mxu1 %v535_v30  ;;  %v1229_v30 = vld [vmem:[%s1610_s7] sm:$0xff] }
 0x118   : > { %870 = vmatpush.bf16.msra.mxu3 %v1229_v30 }
 0x124   : > { %v613_v32 = vpop.f32.mrf.mxu1 }
 0x125   : > { %v614_v33 = vadd.f32 %v1450_v31, %v613_v32 }
 0x127   : > { %v653_v34 = vmax.f32 %v614_v33, 0.0 }
 0x129   : > { %976 = vst.msk [vmem:[%s1457_s17] sm:$0xff] %vm697_vm1, %v653_v34 }
 0x12c   : > { %v615_v35 = vpop.f32.mrf.mxu1 }
 0x12d   : > { %v616_v36 = vadd.f32 %v1450_v31, %v615_v35 }
 0x12f   : > { %v654_v37 = vmax.f32 %v616_v36, 0.0 }
 0x131   : > { %v669_v38 = vpack.c.bf16 %v654_v37, %v653_v34  ;;  %977 = vst.msk [vmem:[%s1457_s17 + $0x8] sm:$0xff] %vm697_vm1, %v654_v37  ;;  %v1247_v34 = vld [vmem:[%s1609_s6] ss:$0 sm:$0xff] }
 0x133   : > { %1173 = vmatmul.msk.bf16.vlgmr.msra.gmra.mxu2 %vm697_vm1, %v669_v38 }
 0x134   : > { %v618_v39 = vpop.f32.mrf.mxu1 }
 0x135   : > { %v619_v40 = vadd.f32 %v1450_v31, %v618_v39 }
 0x137   : > { %v655_v41 = vmax.f32 %v619_v40, 0.0 }
 0x139   : > { %978 = vst.msk [vmem:[%s1457_s17 + $0x10] sm:$0xff] %vm697_vm1, %v655_v41 }
 0x13c   : > { %v620_v42 = vpop.f32.mrf.mxu1 }
 0x13d   : > { %v621_v43 = vadd.f32 %v1450_v31, %v620_v42 }
 0x13f   : > { %v656_v44 = vmax.f32 %v621_v43, 0.0 }
 0x141   : > { %v670_v45 = vpack.c.bf16 %v656_v44, %v655_v41  ;;  %979 = vst.msk [vmem:[%s1457_s17 + $0x18] sm:$0xff] %vm697_vm1, %v656_v44 }
 0x143   : > { %1174 = vmatmul.msk.bf16.gmra.mxu2 %vm697_vm1, %v670_v45 }
 0x144   : > { %v623_v46 = vpop.f32.mrf.mxu1 }
 0x145   : > { %v624_v47 = vadd.f32 %v1450_v31, %v623_v46 }
 0x147   : > { %v657_v48 = vmax.f32 %v624_v47, 0.0 }
 0x149   : > { %980 = vst.msk [vmem:[%s1457_s17 + $0x20] sm:$0xff] %vm697_vm1, %v657_v48 }
 0x14c   : > { %v625_v49 = vpop.f32.mrf.mxu1 }
 0x14d   : > { %v626_v50 = vadd.f32 %v1450_v31, %v625_v49 }
 0x14f   : > { %v658_v51 = vmax.f32 %v626_v50, 0.0 }
 0x151   : > { %v671_v52 = vpack.c.bf16 %v658_v51, %v657_v48  ;;  %981 = vst.msk [vmem:[%s1457_s17 + $0x28] sm:$0xff] %vm697_vm1, %v658_v51 }
 0x153   : > { %1175 = vmatmul.msk.bf16.gmra.mxu2 %vm697_vm1, %v671_v52 }
 0x154   : > { %v628_v53 = vpop.f32.mrf.mxu1 }
 0x155   : > { %v629_v54 = vadd.f32 %v1450_v31, %v628_v53 }
 0x157   : > { %v659_v55 = vmax.f32 %v629_v54, 0.0 }
 0x159   : > { %982 = vst.msk [vmem:[%s1457_s17 + $0x30] sm:$0xff] %vm697_vm1, %v659_v55 }
 0x15c   : > { %v630_v56 = vpop.f32.mrf.mxu1 }
 0x15d   : > { %v631_v57 = vadd.f32 %v1450_v31, %v630_v56 }
 0x15f   : > { %v660_v58 = vmax.f32 %v631_v57, 0.0 }
 0x161   : > { %v672_v59 = vpack.c.bf16 %v660_v58, %v659_v55  ;;  %983 = vst.msk [vmem:[%s1457_s17 + $0x38] sm:$0xff] %vm697_vm1, %v660_v58 }
 0x163   : > { %1176 = vmatmul.msk.bf16.gmra.mxu2 %vm697_vm1, %v672_v59 }
 0x164   : > { %v633_v60 = vpop.f32.mrf.mxu1 }
 0x165   : > { %v634_v61 = vadd.f32 %v1450_v31, %v633_v60 }
 0x167   : > { %v661_v62 = vmax.f32 %v634_v61, 0.0 }
 0x169   : > { %984 = vst.msk [vmem:[%s1457_s17 + $0x40] sm:$0xff] %vm697_vm1, %v661_v62 }
 0x16c   : > { %v635_v63 = vpop.f32.mrf.mxu1 }
 0x16d   : > { %v636_v0 = vadd.f32 %v1450_v31, %v635_v63 }
 0x16f   : > { %v662_v1 = vmax.f32 %v636_v0, 0.0 }
 0x171   : > { %v673_v2 = vpack.c.bf16 %v662_v1, %v661_v62  ;;  %985 = vst.msk [vmem:[%s1457_s17 + $0x48] sm:$0xff] %vm697_vm1, %v662_v1 }
 0x173   : > { %1177 = vmatmul.msk.bf16.gmra.mxu2 %vm697_vm1, %v673_v2 }
 0x174   : > { %v638_v3 = vpop.f32.mrf.mxu1 }
 0x175   : > { %v639_v4 = vadd.f32 %v1450_v31, %v638_v3 }
 0x177   : > { %v663_v5 = vmax.f32 %v639_v4, 0.0 }
 0x179   : > { %986 = vst.msk [vmem:[%s1457_s17 + $0x50] sm:$0xff] %vm697_vm1, %v663_v5 }
 0x17c   : > { %v640_v6 = vpop.f32.mrf.mxu1 }
 0x17d   : > { %v641_v7 = vadd.f32 %v1450_v31, %v640_v6 }
 0x17f   : > { %v664_v8 = vmax.f32 %v641_v7, 0.0 }
 0x181   : > { %v674_v9 = vpack.c.bf16 %v664_v8, %v663_v5  ;;  %987 = vst.msk [vmem:[%s1457_s17 + $0x58] sm:$0xff] %vm697_vm1, %v664_v8 }
 0x183   : > { %1178 = vmatmul.msk.bf16.gmra.mxu2 %vm697_vm1, %v674_v9 }
 0x184   : > { %v643_v11 = vpop.f32.mrf.mxu1 }
 0x185   : > { %v644_v12 = vadd.f32 %v1450_v31, %v643_v11 }
 0x187   : > { %v665_v14 = vmax.f32 %v644_v12, 0.0 }
 0x189   : > { %988 = vst.msk [vmem:[%s1457_s17 + $0x60] sm:$0xff] %vm697_vm1, %v665_v14 }
 0x18c   : > { %v645_v16 = vpop.f32.mrf.mxu1 }
 0x18d   : > { %v646_v17 = vadd.f32 %v1450_v31, %v645_v16 }
 0x18f   : > { %v666_v19 = vmax.f32 %v646_v17, 0.0 }
 0x191   : > { %v675_v20 = vpack.c.bf16 %v666_v19, %v665_v14  ;;  %989 = vst.msk [vmem:[%s1457_s17 + $0x68] sm:$0xff] %vm697_vm1, %v666_v19 }
 0x193   : > { %1179 = vmatmul.msk.bf16.gmra.mxu2 %vm697_vm1, %v675_v20 }
 0x194   : > { %v648_v21 = vpop.f32.mrf.mxu1 }
 0x195   : > { %v649_v23 = vadd.f32 %v1450_v31, %v648_v21 }
 0x197   : > { %v667_v24 = vmax.f32 %v649_v23, 0.0 }
 0x199   : > { %990 = vst.msk [vmem:[%s1457_s17 + $0x70] sm:$0xff] %vm697_vm1, %v667_v24 }
 0x19c   : > { %v650_v26 = vpop.f32.mrf.mxu1 }
 0x19d   : > { %v651_v28 = vadd.f32 %v1450_v31, %v650_v26 }
 0x19f   : > { %v668_v29 = vmax.f32 %v651_v28, 0.0 }
 0x1a1   : > { %v676_v32 = vpack.c.bf16 %v668_v29, %v667_v24  ;;  %991 = vst.msk [vmem:[%s1457_s17 + $0x78] sm:$0xff] %vm697_vm1, %v668_v29 }
 0x1a3   : > { %1180 = vmatmul.msk.bf16.gmra.mxu2 %vm697_vm1, %v676_v32 }
 0x1b6   : > { %v731_v33 = vpop.f32.mrf.mxu2 }
 0x1b7   : > { %v732_v35 = vadd.f32 %v1247_v34, %v731_v33 }
 0x1b9   : > { %v771_v37 = vmax.f32 %v732_v35, 0.0 }
 0x1be   : > { %v733_v36 = vpop.f32.mrf.mxu2 }
 0x1bf   : > { %v734_v31 = vadd.f32 %v1247_v34, %v733_v36 }
 0x1c1   : > { %v772_v38 = vmax.f32 %v734_v31, 0.0 }
 0x1c3   : > { %v787_v39 = vpack.c.bf16 %v772_v38, %v771_v37 }
 0x1c5   : > { %871 = vmatmul.bf16.vlgmr.msra.gmra.mxu3 %v787_v39 }
 0x1c6   : > { %v736_v40 = vpop.f32.mrf.mxu2 }
 0x1c7   : > { %v737_v41 = vadd.f32 %v1247_v34, %v736_v40 }
 0x1c9   : > { %v773_v44 = vmax.f32 %v737_v41, 0.0 }
 0x1ce   : > { %v738_v42 = vpop.f32.mrf.mxu2 }
 0x1cf   : > { %v739_v43 = vadd.f32 %v1247_v34, %v738_v42 }
 0x1d1   : > { %v774_v45 = vmax.f32 %v739_v43, 0.0 }
 0x1d3   : > { %v788_v46 = vpack.c.bf16 %v774_v45, %v773_v44 }
 0x1d5   : > { %876 = vmatmul.bf16.gmra.mxu3 %v788_v46 }
 0x1d6   : > { %v741_v47 = vpop.f32.mrf.mxu2 }
 0x1d7   : > { %v742_v48 = vadd.f32 %v1247_v34, %v741_v47 }
 0x1d9   : > { %v775_v51 = vmax.f32 %v742_v48, 0.0 }
 0x1de   : > { %v743_v49 = vpop.f32.mrf.mxu2 }
 0x1df   : > { %v744_v50 = vadd.f32 %v1247_v34, %v743_v49 }
 0x1e1   : > { %v776_v52 = vmax.f32 %v744_v50, 0.0 }
 0x1e3   : > { %v789_v53 = vpack.c.bf16 %v776_v52, %v775_v51 }
 0x1e5   : > { %881 = vmatmul.bf16.gmra.mxu3 %v789_v53 }
 0x1e6   : > { %v746_v54 = vpop.f32.mrf.mxu2 }
 0x1e7   : > { %v747_v55 = vadd.f32 %v1247_v34, %v746_v54 }
 0x1e9   : > { %v777_v58 = vmax.f32 %v747_v55, 0.0 }
 0x1ee   : > { %v748_v56 = vpop.f32.mrf.mxu2 }
 0x1ef   : > { %v749_v57 = vadd.f32 %v1247_v34, %v748_v56 }
 0x1f1   : > { %v778_v59 = vmax.f32 %v749_v57, 0.0 }
 0x1f3   : > { %v790_v60 = vpack.c.bf16 %v778_v59, %v777_v58 }
 0x1f5   : > { %886 = vmatmul.bf16.gmra.mxu3 %v790_v60 }
 0x1f6   : > { %v751_v61 = vpop.f32.mrf.mxu2 }
 0x1f7   : > { %v752_v62 = vadd.f32 %v1247_v34, %v751_v61 }
 0x1f9   : > { %v779_v1 = vmax.f32 %v752_v62, 0.0 }
 0x1fe   : > { %v753_v63 = vpop.f32.mrf.mxu2 }
 0x1ff   : > { %v754_v0 = vadd.f32 %v1247_v34, %v753_v63 }
 0x201   : > { %v780_v2 = vmax.f32 %v754_v0, 0.0 }
 0x203   : > { %v791_v3 = vpack.c.bf16 %v780_v2, %v779_v1 }
 0x205   : > { %891 = vmatmul.bf16.gmra.mxu3 %v791_v3 }
 0x206   : > { %v756_v4 = vpop.f32.mrf.mxu2 }
 0x207   : > { %v757_v5 = vadd.f32 %v1247_v34, %v756_v4 }
 0x209   : > { %v781_v8 = vmax.f32 %v757_v5, 0.0 }
 0x20e   : > { %v758_v6 = vpop.f32.mrf.mxu2 }
 0x20f   : > { %v759_v7 = vadd.f32 %v1247_v34, %v758_v6 }
 0x211   : > { %v782_v9 = vmax.f32 %v759_v7, 0.0 }
 0x213   : > { %v792_v10 = vpack.c.bf16 %v782_v9, %v781_v8 }
 0x215   : > { %896 = vmatmul.bf16.gmra.mxu3 %v792_v10 }
 0x216   : > { %v761_v11 = vpop.f32.mrf.mxu2 }
 0x217   : > { %v762_v12 = vadd.f32 %v1247_v34, %v761_v11 }
 0x219   : > { %v783_v15 = vmax.f32 %v762_v12, 0.0 }
 0x21e   : > { %v763_v13 = vpop.f32.mrf.mxu2 }
 0x21f   : > { %v764_v14 = vadd.f32 %v1247_v34, %v763_v13 }
 0x221   : > { %v784_v16 = vmax.f32 %v764_v14, 0.0 }
 0x223   : > { %v793_v17 = vpack.c.bf16 %v784_v16, %v783_v15 }
 0x225   : > { %901 = vmatmul.bf16.gmra.mxu3 %v793_v17 }
 0x226   : > { %v766_v18 = vpop.f32.mrf.mxu2 }
 0x227   : > { %v767_v19 = vadd.f32 %v1247_v34, %v766_v18 }
 0x229   : > { %v785_v22 = vmax.f32 %v767_v19, 0.0 }
 0x22e   : > { %v768_v20 = vpop.f32.mrf.mxu2 }
 0x22f   : > { %v769_v21 = vadd.f32 %v1247_v34, %v768_v20 }
 0x231   : > { %v786_v23 = vmax.f32 %v769_v21, 0.0 }
 0x233   : > { %v794_v24 = vpack.c.bf16 %v786_v23, %v785_v22 }
 0x235   : > { %906 = vmatmul.bf16.gmra.mxu3 %v794_v24 }
 0x248   : > { %v872_v26 = vpop.f32.mrf.mxu3 }
 0x249   : > { %v873_v27 = vadd.f32 %v1544_v25, %v872_v26 }
 0x24b   : > { %v912_v28 = vmul.f32 0.5, %v873_v27 }
 0x24d   : > { %1249 = vtanh.f32 %v912_v28 }
 0x250   : > { %v874_v29 = vpop.f32.mrf.mxu3 }
 0x251   : > { %v875_v30 = vadd.f32 %v1544_v25, %v874_v29 }
 0x253   : > { %v1250_v32 = vpop.eup %1249  ;;  %v913_v33 = vmul.f32 0.5, %v875_v30 }
 0x254   : > { %v944_v34 = vadd.f32 1.0, %v1250_v32 }
 0x255   : > { %1251 = vtanh.f32 %v913_v33 }
 0x256   : > { %v960_v35 = vmul.f32 0.5, %v944_v34 }
 0x258   : > { %992 = vst.msk [vmem:[%s1552_s23] sm:$0xff] %vm438_vm0, %v960_v35  ;;  %v877_v36 = vpop.f32.mrf.mxu3 }
 0x259   : > { %v878_v31 = vadd.f32 %v1544_v25, %v877_v36 }
 0x25b   : > { %v1252_v37 = vpop.eup %1251  ;;  %v914_v38 = vmul.f32 0.5, %v878_v31 }
 0x25c   : > { %v945_v39 = vadd.f32 1.0, %v1252_v37 }
 0x25d   : > { %1253 = vtanh.f32 %v914_v38 }
 0x25e   : > { %v961_v40 = vmul.f32 0.5, %v945_v39 }
 0x260   : > { %993 = vst.msk [vmem:[%s1552_s23 + $0x8] sm:$0xff] %vm438_vm0, %v961_v40  ;;  %v879_v41 = vpop.f32.mrf.mxu3 }
 0x261   : > { %v880_v42 = vadd.f32 %v1544_v25, %v879_v41 }
 0x263   : > { %v1254_v43 = vpop.eup %1253  ;;  %v915_v44 = vmul.f32 0.5, %v880_v42 }
 0x264   : > { %v946_v45 = vadd.f32 1.0, %v1254_v43 }
 0x265   : > { %1255 = vtanh.f32 %v915_v44 }
 0x266   : > { %v962_v46 = vmul.f32 0.5, %v946_v45 }
 0x268   : > { %994 = vst.msk [vmem:[%s1552_s23 + $0x10] sm:$0xff] %vm438_vm0, %v962_v46  ;;  %v882_v47 = vpop.f32.mrf.mxu3 }
 0x269   : > { %v883_v48 = vadd.f32 %v1544_v25, %v882_v47 }
 0x26b   : > { %v1256_v49 = vpop.eup %1255  ;;  %v916_v50 = vmul.f32 0.5, %v883_v48 }
 0x26c   : > { %v947_v51 = vadd.f32 1.0, %v1256_v49 }
 0x26d   : > { %1257 = vtanh.f32 %v916_v50 }
 0x26e   : > { %v963_v52 = vmul.f32 0.5, %v947_v51 }
 0x270   : > { %995 = vst.msk [vmem:[%s1552_s23 + $0x18] sm:$0xff] %vm438_vm0, %v963_v52  ;;  %v884_v53 = vpop.f32.mrf.mxu3 }
 0x271   : > { %v885_v54 = vadd.f32 %v1544_v25, %v884_v53 }
 0x273   : > { %v1258_v55 = vpop.eup %1257  ;;  %v917_v56 = vmul.f32 0.5, %v885_v54 }
 0x274   : > { %v948_v57 = vadd.f32 1.0, %v1258_v55 }
 0x275   : > { %1259 = vtanh.f32 %v917_v56 }
 0x276   : > { %v964_v58 = vmul.f32 0.5, %v948_v57 }
 0x278   : > { %996 = vst.msk [vmem:[%s1552_s23 + $0x20] sm:$0xff] %vm438_vm0, %v964_v58  ;;  %v887_v59 = vpop.f32.mrf.mxu3 }
 0x279   : > { %v888_v60 = vadd.f32 %v1544_v25, %v887_v59 }
 0x27b   : > { %v1260_v61 = vpop.eup %1259  ;;  %v918_v62 = vmul.f32 0.5, %v888_v60 }
 0x27c   : > { %v949_v63 = vadd.f32 1.0, %v1260_v61 }
 0x27d   : > { %1261 = vtanh.f32 %v918_v62 }
 0x27e   : > { %v965_v0 = vmul.f32 0.5, %v949_v63 }
 0x280   : > { %997 = vst.msk [vmem:[%s1552_s23 + $0x28] sm:$0xff] %vm438_vm0, %v965_v0  ;;  %v889_v1 = vpop.f32.mrf.mxu3 }
 0x281   : > { %v890_v2 = vadd.f32 %v1544_v25, %v889_v1 }
 0x283   : > { %v1262_v3 = vpop.eup %1261  ;;  %v919_v4 = vmul.f32 0.5, %v890_v2 }
 0x284   : > { %v950_v5 = vadd.f32 1.0, %v1262_v3 }
 0x285   : > { %1263 = vtanh.f32 %v919_v4 }
 0x286   : > { %v966_v6 = vmul.f32 0.5, %v950_v5 }
 0x288   : > { %998 = vst.msk [vmem:[%s1552_s23 + $0x30] sm:$0xff] %vm438_vm0, %v966_v6  ;;  %v892_v7 = vpop.f32.mrf.mxu3 }
 0x289   : > { %v893_v8 = vadd.f32 %v1544_v25, %v892_v7 }
 0x28b   : > { %v1264_v9 = vpop.eup %1263  ;;  %v920_v10 = vmul.f32 0.5, %v893_v8 }
 0x28c   : > { %v951_v11 = vadd.f32 1.0, %v1264_v9 }
 0x28d   : > { %1265 = vtanh.f32 %v920_v10 }
 0x28e   : > { %v967_v12 = vmul.f32 0.5, %v951_v11 }
 0x290   : > { %999 = vst.msk [vmem:[%s1552_s23 + $0x38] sm:$0xff] %vm438_vm0, %v967_v12  ;;  %v894_v13 = vpop.f32.mrf.mxu3 }
 0x291   : > { %v895_v14 = vadd.f32 %v1544_v25, %v894_v13 }
 0x293   : > { %v1266_v15 = vpop.eup %1265  ;;  %v921_v16 = vmul.f32 0.5, %v895_v14 }
 0x294   : > { %v952_v17 = vadd.f32 1.0, %v1266_v15 }
 0x295   : > { %1267 = vtanh.f32 %v921_v16 }
 0x296   : > { %v968_v18 = vmul.f32 0.5, %v952_v17 }
 0x298   : > { %1000 = vst.msk [vmem:[%s1552_s23 + $0x40] sm:$0xff] %vm438_vm0, %v968_v18  ;;  %v897_v19 = vpop.f32.mrf.mxu3 }
 0x299   : > { %v898_v20 = vadd.f32 %v1544_v25, %v897_v19 }
 0x29b   : > { %v1268_v21 = vpop.eup %1267  ;;  %v922_v22 = vmul.f32 0.5, %v898_v20 }
 0x29c   : > { %v953_v23 = vadd.f32 1.0, %v1268_v21 }
 0x29d   : > { %1269 = vtanh.f32 %v922_v22 }
 0x29e   : > { %v969_v24 = vmul.f32 0.5, %v953_v23 }
 0x2a0   : > { %1001 = vst.msk [vmem:[%s1552_s23 + $0x48] sm:$0xff] %vm438_vm0, %v969_v24  ;;  %v899_v26 = vpop.f32.mrf.mxu3 }
 0x2a1   : > { %v900_v27 = vadd.f32 %v1544_v25, %v899_v26 }
 0x2a3   : > { %v1270_v28 = vpop.eup %1269  ;;  %v923_v29 = vmul.f32 0.5, %v900_v27 }
 0x2a4   : > { %v954_v30 = vadd.f32 1.0, %v1270_v28 }
 0x2a5   : > { %1271 = vtanh.f32 %v923_v29 }
 0x2a6   : > { %v970_v32 = vmul.f32 0.5, %v954_v30 }
 0x2a8   : > { %1002 = vst.msk [vmem:[%s1552_s23 + $0x50] sm:$0xff] %vm438_vm0, %v970_v32  ;;  %v902_v33 = vpop.f32.mrf.mxu3 }
 0x2a9   : > { %v903_v34 = vadd.f32 %v1544_v25, %v902_v33 }
 0x2ab   : > { %v1272_v35 = vpop.eup %1271  ;;  %v924_v36 = vmul.f32 0.5, %v903_v34 }
 0x2ac   : > { %v955_v31 = vadd.f32 1.0, %v1272_v35 }
 0x2ad   : > { %1273 = vtanh.f32 %v924_v36 }
 0x2ae   : > { %v971_v37 = vmul.f32 0.5, %v955_v31 }
 0x2b0   : > { %1003 = vst.msk [vmem:[%s1552_s23 + $0x58] sm:$0xff] %vm438_vm0, %v971_v37  ;;  %v904_v38 = vpop.f32.mrf.mxu3 }
 0x2b1   : > { %v905_v39 = vadd.f32 %v1544_v25, %v904_v38 }
 0x2b3   : > { %v1274_v40 = vpop.eup %1273  ;;  %v925_v41 = vmul.f32 0.5, %v905_v39 }
 0x2b4   : > { %v956_v42 = vadd.f32 1.0, %v1274_v40 }
 0x2b5   : > { %1275 = vtanh.f32 %v925_v41 }
 0x2b6   : > { %v972_v43 = vmul.f32 0.5, %v956_v42 }
 0x2b8   : > { %1004 = vst.msk [vmem:[%s1552_s23 + $0x60] sm:$0xff] %vm438_vm0, %v972_v43  ;;  %v907_v44 = vpop.f32.mrf.mxu3 }
 0x2b9   : > { %v908_v45 = vadd.f32 %v1544_v25, %v907_v44 }
 0x2bb   : > { %v1276_v46 = vpop.eup %1275  ;;  %v926_v47 = vmul.f32 0.5, %v908_v45 }
 0x2bc   : > { %v957_v48 = vadd.f32 1.0, %v1276_v46 }
 0x2bd   : > { %1277 = vtanh.f32 %v926_v47 }
 0x2be   : > { %v973_v49 = vmul.f32 0.5, %v957_v48 }
 0x2c0   : > { %1005 = vst.msk [vmem:[%s1552_s23 + $0x68] sm:$0xff] %vm438_vm0, %v973_v49  ;;  %v909_v50 = vpop.f32.mrf.mxu3 }
 0x2c1   : > { %v910_v51 = vadd.f32 %v1544_v25, %v909_v50 }
 0x2c3   : > { %v1278_v52 = vpop.eup %1277  ;;  %v927_v53 = vmul.f32 0.5, %v910_v51 }
 0x2c4   : > { %v958_v54 = vadd.f32 1.0, %v1278_v52 }
 0x2c5   : > { %1279 = vtanh.f32 %v927_v53 }
 0x2c6   : > { %v974_v55 = vmul.f32 0.5, %v958_v54 }
 0x2c8   : > { %1006 = vst.msk [vmem:[%s1552_s23 + $0x70] sm:$0xff] %vm438_vm0, %v974_v55 }
 0x2cb   : > { %v1280_v56 = vpop.eup %1279 }
 0x2cc   : > { %v959_v57 = vadd.f32 1.0, %v1280_v56 }
 0x2ce   : > { %v975_v58 = vmul.f32 0.5, %v959_v57 }
 0x2d0   : > { %1007 = vst.msk [vmem:[%s1552_s23 + $0x78] sm:$0xff] %vm438_vm0, %v975_v58 }
 0x2d1 PF: > { %s21_s13 = sadd.s32 1, %s1287_s13  }
 0x2d2   : > { %p18_p4 = scmp.ge.s32.totalorder %s21_s13, 4  }
 0x2d4   :  { %20 = sbr.rel (!%p18_p4) target bundleno = 1 (0x1), region = 98 }

</bundles_post_ra>
